<compile_context>
chip_gen: v6e
topology: v6e:2x2x1
jax: 0.10.0
libtpu: 0.0.40
codegen_flags: <defaults>
</compile_context>

<pallas_src>
import jax
import jax.numpy as jnp
import numpy as np
from jax.experimental import pallas as pl
from jax.experimental.pallas import tpu as pltpu

EPS = 1e-5


def _vmem_limit_bytes() -> int:
    """Scoped-VMEM budget with headroom under the chip's physical capacity."""
    phys = None
    try:
        phys = getattr(pltpu.get_tpu_info(), "vmem_capacity_bytes", None)
    except Exception:
        phys = None
    if not phys:
        phys = 64 * 1024 * 1024  # assume the smallest generation (v7x) if unknown
    return min((int(phys) * 3) // 4, 96 * 1024 * 1024)


def _pick_channel_tile(total_c: int, per_channel_bytes: int, target_bytes: int,
                       sublane: int, min_grid: int = 2) -> int:
    """Channel tile: multiple of `sublane` dividing total_c (or == total_c),
    fitting the byte target, preferring >=min_grid grid steps (megacore)."""
    candidates = [total_c]
    ct = sublane
    while ct < total_c:
        if total_c % ct == 0:
            candidates.append(ct)
        ct += sublane
    fitting = [c for c in candidates if c * per_channel_bytes <= target_bytes]
    if not fitting:
        # TODO(synk): fall back to a two-pass BN over an N-tiled grid instead of
        # hoping the smallest tile still fits VMEM.
        return min(candidates)
    good = [c for c in fitting
            if total_c // c >= min_grid and c * per_channel_bytes * 8 >= target_bytes]
    if good:
        return max(good)
    return max(fitting)


def _make_ibn_kernel(ct: int, half: int):
    def kernel(x_ref, w_ref, b_ref, o_ref):
        # x_ref: (N, ct, HW) in the HBM dtype; upcast for the math.
        x = x_ref[...].astype(jnp.float32)

        # Per-(sample, channel) statistics (exactly InstanceNorm's), two-pass.
        mu_in = jnp.mean(x, axis=-1, keepdims=True)                         # (N, ct, 1)
        var_in = jnp.mean(jnp.square(x - mu_in), axis=-1, keepdims=True)    # (N, ct, 1)

        # Exact pooled (biased) BatchNorm statistics from the per-sample ones.
        mu_bn = jnp.mean(mu_in, axis=0, keepdims=True)                      # (1, ct, 1)
        var_bn = jnp.mean(var_in + jnp.square(mu_in - mu_bn),
                          axis=0, keepdims=True)                            # (1, ct, 1)

        # Per-channel select: global channel < half -> InstanceNorm, else BatchNorm.
        c0 = pl.program_id(0) * ct
        ch = c0 + jax.lax.broadcasted_iota(jnp.int32, (1, ct, 1), 1)
        is_in = ch < half
        mu = jnp.where(is_in, mu_in, mu_bn)                                 # (N, ct, 1)
        var = jnp.where(is_in, var_in, var_bn)                              # (N, ct, 1)

        rstd = jax.lax.rsqrt(var + EPS)
        w = w_ref[...][None, :, :]                                          # (1, ct, 1)
        b = b_ref[...][None, :, :]                                          # (1, ct, 1)
        scale = w * rstd
        shift = b - mu * scale
        o_ref[...] = (x * scale + shift).astype(o_ref.dtype)

    return kernel


def ibn_forward(x_nchw, in_w, in_b, bn_w, bn_b, half: int):
    """x_nchw: (N, C, H, W). Returns (N, C, H, W) in the same dtype."""
    N, C, H, W = x_nchw.shape
    HW = H * W
    x = x_nchw.reshape(N, C, HW)  # contiguous merge: free, keeps HBM dtype

    # Single concatenated affine parameter vectors (tiny).
    w_all = jnp.concatenate([in_w, bn_w]).reshape(C, 1).astype(jnp.float32)
    b_all = jnp.concatenate([in_b, bn_b]).reshape(C, 1).astype(jnp.float32)

    itemsize = x.dtype.itemsize
    sublane = 8 if itemsize >= 4 else 32 // itemsize          # bf16 -> 16
    vmem_limit = _vmem_limit_bytes()
    block_target = min(8 * 1024 * 1024, vmem_limit // 5)       # in+out double-buffered
    per_channel_bytes = N * HW * itemsize
    ct = _pick_channel_tile(C, per_channel_bytes, block_target, sublane)

    block_bytes = ct * per_channel_bytes
    vmem_limit = min(max(vmem_limit, 4 * block_bytes + (2 << 20)), 96 * 1024 * 1024)

    out = pl.pallas_call(
        _make_ibn_kernel(ct, half),
        out_shape=jax.ShapeDtypeStruct((N, C, HW), x.dtype),
        grid=(C // ct,),
        in_specs=[
            pl.BlockSpec((N, ct, HW), lambda c: (0, c, 0)),
            pl.BlockSpec((ct, 1), lambda c: (c, 0)),
            pl.BlockSpec((ct, 1), lambda c: (c, 0)),
        ],
        out_specs=pl.BlockSpec((N, ct, HW), lambda c: (0, c, 0)),
        compiler_params=pltpu.CompilerParams(
            dimension_semantics=("parallel",),
            vmem_limit_bytes=vmem_limit,
        ),
    )(x, w_all, b_all)

    return out.reshape(N, C, H, W)


def ibn_reference(x, in_w, in_b, bn_w, bn_b, half: int):
    """Pure-JAX reference mirroring PyTorch training-mode IBN forward."""
    x_in = x[:, :half]
    x_bn = x[:, half:]
    mu_i = jnp.mean(x_in, axis=(2, 3), keepdims=True)
    var_i = jnp.mean((x_in - mu_i) ** 2, axis=(2, 3), keepdims=True)
    y_in = (x_in - mu_i) / jnp.sqrt(var_i + EPS)
    y_in = y_in * in_w[None, :, None, None] + in_b[None, :, None, None]

    mu_b = jnp.mean(x_bn, axis=(0, 2, 3), keepdims=True)
    var_b = jnp.mean((x_bn - mu_b) ** 2, axis=(0, 2, 3), keepdims=True)
    y_bn = (x_bn - mu_b) / jnp.sqrt(var_b + EPS)
    y_bn = y_bn * bn_w[None, :, None, None] + bn_b[None, :, None, None]
    return jnp.concatenate([y_in, y_bn], axis=1)


if __name__ == "__main__":
    # Small shapes consistent with the module: NCHW input.
    N, C, H, W = 2, 4, 16, 16
    ratio = 0.5
    half = int(C * ratio)  # = 2

    key = jax.random.PRNGKey(0)
    kx, k1, k2, k3, k4 = jax.random.split(key, 5)

    x = jax.random.normal(kx, (N, C, H, W), dtype=jnp.float32)
    # Deterministic non-trivial affine parameters (PyTorch default would be
    # weight=1, bias=0; perturb to exercise the math).
    in_w = 1.0 + 0.1 * jax.random.normal(k1, (half,), dtype=jnp.float32)
    in_b = 0.1 * jax.random.normal(k2, (half,), dtype=jnp.float32)
    bn_w = 1.0 + 0.1 * jax.random.normal(k3, (C - half,), dtype=jnp.float32)
    bn_b = 0.1 * jax.random.normal(k4, (C - half,), dtype=jnp.float32)

    out = ibn_forward(x, in_w, in_b, bn_w, bn_b, half)
    out = jax.block_until_ready(out)

    ref = jax.block_until_ready(ibn_reference(x, in_w, in_b, bn_w, bn_b, half))
    assert out.shape == (N, C, H, W)
    np.testing.assert_allclose(np.asarray(out), np.asarray(ref), rtol=1e-4, atol=1e-4)

    print("KERNEL_OK")
</pallas_src>

<mosaic_0001>
module attributes {stable_mosaic.version = 11 : i64} {
  func.func @kernel(%arg0: i32, %arg1: memref<2x4x256xf32, #tpu.memory_space<vmem>>, %arg2: memref<4x1xf32, #tpu.memory_space<vmem>>, %arg3: memref<4x1xf32, #tpu.memory_space<vmem>>, %arg4: memref<2x4x256xf32, #tpu.memory_space<vmem>>) attributes {dimension_semantics = [#tpu.dimension_semantics<parallel>], iteration_bounds = array<i64: 1>, scalar_prefetch = 0 : i64, scratch_operands = 0 : i64, tpu.core_type = #tpu.core_type<tc>, window_params = [{transform_indices = @transform_0, window_bounds = array<i64: 2, 4, 256>}, {transform_indices = @transform_1, window_bounds = array<i64: 4, 1>}, {transform_indices = @transform_2, window_bounds = array<i64: 4, 1>}, {transform_indices = @transform_3, window_bounds = array<i64: 2, 4, 256>}]} {
    %c0 = arith.constant 0 : index
    %c0_0 = arith.constant 0 : index
    %c0_1 = arith.constant 0 : index
    %0 = vector.load %arg1[%c0, %c0_0, %c0_1] : memref<2x4x256xf32, #tpu.memory_space<vmem>>, vector<2x4x256xf32>
    %cst = arith.constant dense<0.000000e+00> : vector<2x4xf32>
    %1 = vector.multi_reduction <add>, %0, %cst [2] : vector<2x4x256xf32> to vector<2x4xf32>
    %2 = vector.shape_cast %1 : vector<2x4xf32> to vector<2x4x1xf32>
    %cst_2 = arith.constant 2.560000e+02 : f32
    %3 = vector.broadcast %cst_2 : f32 to vector<2x4x1xf32>
    %4 = arith.divf %2, %3 : vector<2x4x1xf32>
    %5 = vector.broadcast %4 : vector<2x4x1xf32> to vector<2x4x256xf32>
    %6 = arith.subf %0, %5 : vector<2x4x256xf32>
    %7 = arith.mulf %6, %6 : vector<2x4x256xf32>
    %cst_3 = arith.constant dense<0.000000e+00> : vector<2x4xf32>
    %8 = vector.multi_reduction <add>, %7, %cst_3 [2] : vector<2x4x256xf32> to vector<2x4xf32>
    %9 = vector.shape_cast %8 : vector<2x4xf32> to vector<2x4x1xf32>
    %cst_4 = arith.constant 2.560000e+02 : f32
    %10 = vector.broadcast %cst_4 : f32 to vector<2x4x1xf32>
    %11 = arith.divf %9, %10 : vector<2x4x1xf32>
    %cst_5 = arith.constant dense<0.000000e+00> : vector<4x1xf32>
    %12 = vector.multi_reduction <add>, %4, %cst_5 [0] : vector<2x4x1xf32> to vector<4x1xf32>
    %13 = vector.shape_cast %12 : vector<4x1xf32> to vector<1x4x1xf32>
    %cst_6 = arith.constant 2.000000e+00 : f32
    %14 = vector.broadcast %cst_6 : f32 to vector<1x4x1xf32>
    %15 = arith.divf %13, %14 : vector<1x4x1xf32>
    %16 = vector.broadcast %15 : vector<1x4x1xf32> to vector<2x4x1xf32>
    %17 = arith.subf %4, %16 : vector<2x4x1xf32>
    %18 = arith.mulf %17, %17 : vector<2x4x1xf32>
    %19 = arith.addf %11, %18 : vector<2x4x1xf32>
    %cst_7 = arith.constant dense<0.000000e+00> : vector<4x1xf32>
    %20 = vector.multi_reduction <add>, %19, %cst_7 [0] : vector<2x4x1xf32> to vector<4x1xf32>
    %21 = vector.shape_cast %20 : vector<4x1xf32> to vector<1x4x1xf32>
    %cst_8 = arith.constant 2.000000e+00 : f32
    %22 = vector.broadcast %cst_8 : f32 to vector<1x4x1xf32>
    %23 = arith.divf %21, %22 : vector<1x4x1xf32>
    %c4_i32 = arith.constant 4 : i32
    %24 = arith.muli %arg0, %c4_i32 : i32
    %25 = tpu.iota {dimensions = array<i32: 1>} : vector<1x4x1xi32>
    %26 = vector.broadcast %24 : i32 to vector<1x4x1xi32>
    %27 = arith.addi %26, %25 : vector<1x4x1xi32>
    %c2_i32 = arith.constant 2 : i32
    %28 = vector.broadcast %c2_i32 : i32 to vector<1x4x1xi32>
    %29 = arith.cmpi slt, %27, %28 : vector<1x4x1xi32>
    %30 = vector.shape_cast %29 : vector<1x4x1xi1> to vector<1x4x1xi1>
    %31 = vector.broadcast %30 : vector<1x4x1xi1> to vector<2x4x1xi1>
    %32 = vector.shape_cast %15 : vector<1x4x1xf32> to vector<1x4x1xf32>
    %33 = vector.broadcast %32 : vector<1x4x1xf32> to vector<2x4x1xf32>
    %34 = arith.select %31, %4, %33 : vector<2x4x1xi1>, vector<2x4x1xf32>
    %35 = vector.shape_cast %29 : vector<1x4x1xi1> to vector<1x4x1xi1>
    %36 = vector.broadcast %35 : vector<1x4x1xi1> to vector<2x4x1xi1>
    %37 = vector.shape_cast %23 : vector<1x4x1xf32> to vector<1x4x1xf32>
    %38 = vector.broadcast %37 : vector<1x4x1xf32> to vector<2x4x1xf32>
    %39 = arith.select %36, %11, %38 : vector<2x4x1xi1>, vector<2x4x1xf32>
    %cst_9 = arith.constant 9.99999974E-6 : f32
    %40 = vector.broadcast %cst_9 : f32 to vector<2x4x1xf32>
    %41 = arith.addf %39, %40 : vector<2x4x1xf32>
    %42 = math.rsqrt %41 : vector<2x4x1xf32>
    %c0_10 = arith.constant 0 : index
    %c0_11 = arith.constant 0 : index
    %43 = vector.load %arg2[%c0_10, %c0_11] : memref<4x1xf32, #tpu.memory_space<vmem>>, vector<4x1xf32>
    %44 = vector.shape_cast %43 : vector<4x1xf32> to vector<1x4x1xf32>
    %c0_12 = arith.constant 0 : index
    %c0_13 = arith.constant 0 : index
    %45 = vector.load %arg3[%c0_12, %c0_13] : memref<4x1xf32, #tpu.memory_space<vmem>>, vector<4x1xf32>
    %46 = vector.shape_cast %45 : vector<4x1xf32> to vector<1x4x1xf32>
    %47 = vector.broadcast %44 : vector<1x4x1xf32> to vector<2x4x1xf32>
    %48 = arith.mulf %47, %42 : vector<2x4x1xf32>
    %49 = arith.mulf %34, %48 : vector<2x4x1xf32>
    %50 = vector.broadcast %46 : vector<1x4x1xf32> to vector<2x4x1xf32>
    %51 = arith.subf %50, %49 : vector<2x4x1xf32>
    %52 = vector.broadcast %48 : vector<2x4x1xf32> to vector<2x4x256xf32>
    %53 = arith.mulf %0, %52 : vector<2x4x256xf32>
    %54 = vector.broadcast %51 : vector<2x4x1xf32> to vector<2x4x256xf32>
    %55 = arith.addf %53, %54 : vector<2x4x256xf32>
    %c0_14 = arith.constant 0 : index
    %c0_15 = arith.constant 0 : index
    %c0_16 = arith.constant 0 : index
    %56 = vector.load %arg4[%c0_14, %c0_15, %c0_16] : memref<2x4x256xf32, #tpu.memory_space<vmem>>, vector<2x4x256xf32>
    tpu.vector_store %arg4[%c0_14, %c0_15, %c0_16], %55 {strides = array<i32>} : memref<2x4x256xf32, #tpu.memory_space<vmem>>, vector<2x4x256xf32>,
    return
  }
  func.func @transform_0(%arg0: i32) -> (i32, i32, i32) {
    %c0_i32 = arith.constant 0 : i32
    %c0_i32_0 = arith.constant 0 : i32
    %c0_i32_1 = arith.constant 0 : i32
    return %c0_i32, %arg0, %c0_i32_0 : i32, i32, i32
  }
  func.func @transform_1(%arg0: i32) -> (i32, i32) {
    %c0_i32 = arith.constant 0 : i32
    %c0_i32_0 = arith.constant 0 : i32
    return %arg0, %c0_i32 : i32, i32
  }
  func.func @transform_2(%arg0: i32) -> (i32, i32) {
    %c0_i32 = arith.constant 0 : i32
    %c0_i32_0 = arith.constant 0 : i32
    return %arg0, %c0_i32 : i32, i32
  }
  func.func @transform_3(%arg0: i32) -> (i32, i32, i32) {
    %c0_i32 = arith.constant 0 : i32
    %c0_i32_0 = arith.constant 0 : i32
    %c0_i32_1 = arith.constant 0 : i32
    return %c0_i32, %arg0, %c0_i32_0 : i32, i32, i32
  }
}

</mosaic_0001>

<bundles_post_ra>
// kernel: tpu_custom_call.1
= control target key start
LH: loop header
LB: loop body
LE: loop exit
PB: predicated region body
PF: predicated region fallthrough
CT: control target
= control target key end

     0   :  { %8 = vsyncpa [#allocation3], 0  ;;  %s341_s0 = inlined_call_operand.hbm [shape: f32[2,4,256], index: 0, kind: input, shape index: {}]   ;;  %s342_s1 = inlined_call_operand.vmem [shape: f32[4,1], index: 1, kind: input, shape index: {}]   ;;  %s343_s2 = inlined_call_operand.vmem [shape: f32[4,1], index: 2, kind: input, shape index: {}]   ;;  %s344_s3 = inlined_call_operand.hbm [shape: f32[2,4,256], index: 3, kind: output, shape index: {}]  }
   0x1   :  { %9 = vsyncpa [#allocation4], 0  ;;  %s259_s12 = smov [#allocation2]  }
   0x2   :  { %s15_s13 = sshll.u32 %s259_s12, 4  ;;  %s16_s13 = int_to_ptr.vmem [resolvable:$true] %s15_s13 }
   0x3   :  { %s223_s14 = scalar_lea.vmem %s16_s13, 256  ;;  %p228_p1 = scmp.lt.s32.totalorder %s16_s13, %s16_s13 }
   0x4   :  { %p224_p0 = scmp.ne.s32.totalorder %s16_s13, %s223_s14  ;;  %p229_p2 = scmp.lt.s32.totalorder %s223_s14, %s223_s14 }
   0x6   :  { %p230_p3 = por %p229_p2, %p228_p1 }
   0x8   :  { %p231_p4 = pnand %p230_p3, %p224_p0 }
   0xa   :  { %234 = shalt.err (!%p231_p4)
}
   0xb   :  { %s260_s15 = smov 128   ;;  %s261_s16 = smov 8  }
   0xc   :  { %21 = dma.hbm_to_vmem [thread:$0]  %s341_s0, 256, %s16_s13, [#allocation3], %s260_s15, %s260_s15, %s261_s16  }
   0xd   :  { %255 = dma.done.wait [#allocation3], 256  }
   0xe   :  { %256 = vsyncadd [#allocation3], 4294967040  ;;  %vm37_vm0 = vcmask 1043456   ;;  %v291_v0 = vld [vmem:[#allocation2] sm:$0xff]  ;;  %v293_v1 = vld [vmem:[#allocation2 + $0x8] sm:$0xff]  ;;  %v56_v12 = vlaneseq  ;;  %v263_v42 = vmov 0  }
   0xf   :  { %v33_v2 = vcombine.high %v291_v0, %v291_v0  ;;  %v38_v3 = vsel %vm37_vm0, %v291_v0, 0.0  ;;  %v34_v4 = vcombine.high %v293_v1, %v293_v1  ;;  %v43_v6 = vsel %vm37_vm0, %v293_v1, 0.0  ;;  %208 = vset.pattern.permute.xlu1 %v263_v42  ;;  %207 = vset.pattern.permute.xlu0 %v263_v42  ;;  %v122_v59 = vld [vmem:[%s342_s1] sm:$0xf]  ;;  %s264_s1 = smov [#allocation5]  }
  0x10   :  { %v262_v10 = vmov 839922192   ;;  %v57_v14 = vshrl.u32 %v56_v12, 7 }
  0x11   :  { %v39_v5 = vsel %vm37_vm0, %v33_v2, 0.0  ;;  %v44_v7 = vsel %vm37_vm0, %v34_v4, 0.0  ;;  %v54_v11 = vunpack.c.l.s4 %v262_v10  ;;  %v123_v2 = vld [vmem:[%s343_s2] sm:$0xf]  ;;  %s189_s2 = sshll.u32 %s264_s1, 4  ;;  %s190_s2 = int_to_ptr.vmem [resolvable:$true] %s189_s2 }
  0x12   :  { %v40_v8 = vadd.f32 %v39_v5, %v38_v3  ;;  %v45_v9 = vadd.f32 %v44_v7, %v43_v6  ;;  %vm111_vm1 = vcmp.lt.s32.totalorder %v57_v14, 2  ;;  %s235_s22 = scalar_lea.vmem %s190_s2, 256  ;;  %p240_p6 = scmp.lt.s32.totalorder %s190_s2, %s190_s2 }
  0x13   :  { %v55_v13 = vunpack.c.0.s8 %v54_v11  ;;  %p236_p5 = scmp.ne.s32.totalorder %s190_s2, %s235_s22  ;;  %p241_p7 = scmp.lt.s32.totalorder %s235_s22, %s235_s22 }
  0x14   :  { %41 = vadd.xlane.f32.xlu0 %v40_v8 }
  0x15   :  { %v305_v15 = vsub.s32 %v55_v13, %v57_v14  ;;  %p242_p8 = por %p241_p7, %p240_p6 }
  0x17   :  { %p243_p9 = pnand %p242_p8, %p236_p5 }
  0x18   :  { %46 = vadd.xlane.f32.xlu0 %v45_v9 }
  0x9d   :  { %v42_v16 = vpop.xlane.xlu0 %41 }
  0x9e   :  { %v49_v17 = vmul.f32 0.00390625, %v42_v16 }
  0xa0   :  { %v59_v18 = vrot.slane %v49_v17, %v305_v15  ;;  %v91_v22 = vsel %vm37_vm0, %v49_v17, 0.0 }
  0xa1   :  { %v47_v19 = vpop.xlane.xlu0 %46 }
  0xa2   :  { %v50_v20 = vmul.f32 0.00390625, %v47_v19  ;;  %v69_v21 = vsub.f32 %v291_v0, %v59_v18 }
  0xa4   :  { %v92_v23 = vsel %vm37_vm0, %v50_v20, 0.0  ;;  %v71_v24 = vmul.f32 %v69_v21, %v69_v21  ;;  %v66_v25 = vrot.slane %v50_v20, %v305_v15 }
  0xa5   :  { %v93_v26 = vadd.f32 %v92_v23, %v91_v22 }
  0xa6   :  { %v75_v27 = vcombine.high %v71_v24, %v71_v24  ;;  %v70_v28 = vsub.f32 %v293_v1, %v66_v25  ;;  %v79_v30 = vsel %vm37_vm0, %v71_v24, 0.0 }
  0xa7   :  { %v95_v29 = vmul.f32 0.5, %v93_v26 }
  0xa8   :  { %v80_v31 = vsel %vm37_vm0, %v75_v27, 0.0  ;;  %v72_v32 = vmul.f32 %v70_v28, %v70_v28 }
  0xa9   :  { %v81_v33 = vadd.f32 %v80_v31, %v79_v30  ;;  %v96_v34 = vsub.f32 %v49_v17, %v95_v29  ;;  %v97_v35 = vsub.f32 %v50_v20, %v95_v29  ;;  %v114_v36 = vsel %vm111_vm1, %v49_v17, %v95_v29 }
  0xaa   :  { %v76_v37 = vcombine.high %v72_v32, %v72_v32  ;;  %v115_v38 = vsel %vm111_vm1, %v50_v20, %v95_v29  ;;  %v84_v39 = vsel %vm37_vm0, %v72_v32, 0.0 }
  0xab   :  { %82 = vadd.xlane.f32.xlu1 %v81_v33  ;;  %v98_v45 = vmul.f32 %v96_v34, %v96_v34  ;;  %v99_v48 = vmul.f32 %v97_v35, %v97_v35 }
  0xac   :  { %v85_v40 = vsel %vm37_vm0, %v76_v37, 0.0 }
  0xad   :  { %v86_v41 = vadd.f32 %v85_v40, %v84_v39 }
  0xaf   :  { %87 = vadd.xlane.f32.xlu1 %v86_v41 }
 0x134   :  { %v83_v43 = vpop.xlane.xlu1 %82 }
 0x135   :  { %v89_v44 = vmul.f32 0.00390625, %v83_v43 }
 0x137   :  { %v100_v47 = vadd.f32 %v98_v45, %v89_v44 }
 0x138   :  { %v88_v46 = vpop.xlane.xlu1 %87 }
 0x139   :  { %v90_v49 = vmul.f32 0.00390625, %v88_v46  ;;  %v102_v51 = vsel %vm37_vm0, %v100_v47, 0.0 }
 0x13b   :  { %v101_v50 = vadd.f32 %v99_v48, %v90_v49 }
 0x13d   :  { %v103_v52 = vsel %vm37_vm0, %v101_v50, 0.0 }
 0x13e   :  { %v104_v53 = vadd.f32 %v103_v52, %v102_v51 }
 0x140   :  { %v105_v54 = vmul.f32 0.5, %v104_v53 }
 0x142   :  { %v116_v55 = vsel %vm111_vm1, %v89_v44, %v105_v54  ;;  %v117_v56 = vsel %vm111_vm1, %v90_v49, %v105_v54 }
 0x143   :  { %v118_v57 = vadd.f32 1e-05, %v116_v55  ;;  %v119_v58 = vadd.f32 1e-05, %v117_v56 }
 0x145   :  { %211 = vrsqrt.f32 %v118_v57 }
 0x146   :  { %213 = vrsqrt.f32 %v119_v58 }
 0x152   :  { %v212_v60 = vpop.eup %211 }
 0x153   :  { %v214_v61 = vpop.eup %213  ;;  %v124_v62 = vmul.f32 %v212_v60, %v122_v59 }
 0x154   :  { %v125_v63 = vmul.f32 %v214_v61, %v122_v59 }
 0x155   :  { %132 = vperm.xlu0 %207, %v124_v62   ;;  %v126_v3 = vmul.f32 %v124_v62, %v114_v36 }
 0x156   :  { %136 = vperm.xlu1 %208, %v125_v63   ;;  %v127_v4 = vmul.f32 %v125_v63, %v115_v38 }
 0x157   :  { %v128_v5 = vsub.f32 %v123_v2, %v126_v3 }
 0x158   :  { %v129_v6 = vsub.f32 %v123_v2, %v127_v4 }
 0x15a   :  { %158 = vperm.xlu1 %208, %v128_v5  }
 0x15e   :  { %162 = vperm.xlu1 %208, %v129_v6  }
 0x1d0   :  { %v133_v7 = vpop.permute.xlu0 %132 }
 0x1d1   :  { %v137_v8 = vpop.permute.xlu1 %136  ;;  %v144_v9 = vrot.slane %v133_v7, %v305_v15 }
 0x1d2   :  { %v151_v11 = vrot.slane %v137_v8, %v305_v15 }
 0x1d3   :  { %v154_v12 = vmul.f32 %v144_v9, %v291_v0 }
 0x1d4   :  { %v155_v17 = vmul.f32 %v151_v11, %v293_v1 }
 0x1d5   :  { %v159_v10 = vpop.permute.xlu1 %158 }
 0x1d6   :  { %v170_v13 = vrot.slane %v159_v10, %v305_v15 }
 0x1d8   :  { %v180_v14 = vadd.f32 %v170_v13, %v154_v12 }
 0x1d9   :  { %v163_v16 = vpop.permute.xlu1 %162 }
 0x1da   :  { %182 = vst [vmem:[#allocation5] sm:$0xff] %v180_v14  ;;  %v177_v18 = vrot.slane %v163_v16, %v305_v15 }
 0x1dc   :  { %v181_v19 = vadd.f32 %v177_v18, %v155_v17 }
 0x1de   :  { %183 = vst [vmem:[#allocation5 + $0x8] sm:$0xff] %v181_v19 }
 0x1df   :  { %246 = shalt.err (!%p243_p9)
}
 0x1e0   :  { %195 = dma.vmem_to_hbm [thread:$0]  %s190_s2, 256, %s344_s3, [#allocation4], %s260_s15, %s260_s15, %s261_s16  }
 0x1e1   :  { %257 = dma.done.wait [#allocation4], 256  }
 0x1e2   :  { %258 = vsyncadd [#allocation4], 4294967040 }
 0x1e3   :  { %199 = vsyncpa [#allocation3], 1 }
 0x1e4   :  { %200 = vsyncpa [#allocation4], 1 }

</bundles_post_ra>
